<compile_context>
chip_gen: v7x
topology: tpu7x:2x2x1
jax: 0.10.0
libtpu: 0.0.40
codegen_flags: <defaults>
</compile_context>

<pallas_src>
import numpy as np
import jax
import jax.numpy as jnp
from jax.experimental import pallas as pl
from jax.experimental.pallas import tpu as pltpu


# ----------------------------- static helpers -----------------------------

def _build_gather_table(un_pool_expand_nums):
    src = [0]
    for idx, expand_num in enumerate(un_pool_expand_nums):
        src.extend([idx + 1] * int(expand_num))
    return src


def _round_up(v, m):
    return -(-v // m) * m


def _choose_tiles(r, t, j_in, j_out, itemsize, target_pair_bytes):
    """Pick (r_blk, t_blk) so the padded (input + output) block pair stays under
    target_pair_bytes.  The joint dim is always kept whole (it equals the full array
    dim, so the (8,128) constraint is satisfied); T tiles are multiples of 128 that
    divide T; the leading R dim is unconstrained by layout rules."""
    jp = _round_up(j_in, 8) + _round_up(j_out, 8)   # sublane-padded joint extents

    def pair_bytes(rb, tb):
        return rb * jp * _round_up(tb, 128) * itemsize

    r_blk, t_blk = r, t
    # Shrink the lane (T) tile first; halves stay multiples of 128 and divisors of T.
    while pair_bytes(r_blk, t_blk) > target_pair_bytes and t_blk % 256 == 0:
        t_blk //= 2
    # Then shrink the R tile (also yields more grid steps for megacore sharding).
    while pair_bytes(r_blk, t_blk) > target_pair_bytes and r_blk % 2 == 0 and r_blk > 1:
        r_blk //= 2
    return r_blk, t_blk


# ----------------------------- Pallas kernel -----------------------------

def _make_unpool_kernel(src):
    """Build the kernel body with the gather/duplication table statically unrolled.

    dests maps each input joint -> list of output joint positions, so every input
    joint is loaded once per block and stored to each of its duplicate slots."""
    dests = {}
    for jo, ji in enumerate(src):
        dests.setdefault(ji, []).append(jo)

    def kernel(x_ref, o_ref):
        # x_ref: (r_blk, J_in, t_blk) VMEM tile, o_ref: (r_blk, J_out, t_blk) VMEM tile.
        for ji, jos in dests.items():
            v = x_ref[:, ji:ji + 1, :]          # load input joint once
            for jo in jos:
                o_ref[:, jo:jo + 1, :] = v      # route to every duplicate position

    return kernel


# ----------------------------- wrapper -----------------------------

def skeleton_unpool_pallas(x, un_pool_expand_nums, *, target_pair_bytes=8 << 20):
    n, c, j_in, t = x.shape
    assert j_in == 1 + len(un_pool_expand_nums), (j_in, len(un_pool_expand_nums))

    src = _build_gather_table(un_pool_expand_nums)    # static (trace-time) table
    j_out = len(src)
    r = n * c

    # (N, C, J, T) -> (N*C, J, T): contiguous reshape, no data movement.
    x_rjt = x.reshape(r, j_in, t)

    r_blk, t_blk = _choose_tiles(r, t, j_in, j_out, x.dtype.itemsize, target_pair_bytes)
    grid = (r // r_blk, t // t_blk)

    pair = (r_blk * (_round_up(j_in, 8) + _round_up(j_out, 8))
            * _round_up(t_blk, 128) * x.dtype.itemsize)
    # Double-buffered in+out pair plus headroom; explicit so v5e (16 MiB default scoped
    # VMEM) gets enough, capped well under v7x's 64 MiB physical VMEM.
    vmem_limit = int(min(max(32 << 20, 2 * pair + (4 << 20)), 48 << 20))

    out_rjt = pl.pallas_call(
        _make_unpool_kernel(src),
        out_shape=jax.ShapeDtypeStruct((r, j_out, t), x.dtype),
        grid=grid,
        in_specs=[pl.BlockSpec((r_blk, j_in, t_blk), lambda i, k: (i, 0, k))],
        out_specs=pl.BlockSpec((r_blk, j_out, t_blk), lambda i, k: (i, 0, k)),
        compiler_params=pltpu.CompilerParams(
            dimension_semantics=("parallel", "parallel"),
            vmem_limit_bytes=vmem_limit),
    )(x_rjt)

    # (N*C, J_out, T) -> (N, C, J_out, T): free reshape.
    return out_rjt.reshape(n, c, j_out, t)


class SkeletonUnPoolPallas:
    """Drop-in functional equivalent of the PyTorch SkeletonUnPool module."""

    def __init__(self, un_pool_expand_nums):
        self.un_pool_expand_nums = list(un_pool_expand_nums)

    def __call__(self, x, **kwargs):
        return skeleton_unpool_pallas(x, self.un_pool_expand_nums, **kwargs)

    # pure-JAX reference (mirrors the torch forward) for correctness checking
    def reference(self, x):
        parts = [x[:, :, 0:1, :]]
        for idx, expand_num in enumerate(self.un_pool_expand_nums):
            j = idx + 1
            parts.append(jnp.repeat(x[:, :, j:j + 1, :], expand_num, axis=2))
        return jnp.concatenate(parts, axis=2)


# ----------------------------- demo -----------------------------

if __name__ == "__main__":
    key = jax.random.PRNGKey(0)

    # Case 1: small native shapes (single-block path).
    un_pool_expand_nums = [2, 1, 3]           # joints 1..3 expand to 2, 1, 3 copies
    N, C, T = 2, 4, 16
    J = 1 + len(un_pool_expand_nums)          # 4 input joints -> 7 output joints
    x = jax.random.normal(key, (N, C, J, T), dtype=jnp.float32)

    module = SkeletonUnPoolPallas(un_pool_expand_nums)
    out = jax.block_until_ready(module(x))
    ref = jax.block_until_ready(module.reference(x))
    assert out.shape == ref.shape == (N, C, 1 + sum(un_pool_expand_nums), T), \
        (out.shape, ref.shape)
    assert jnp.array_equal(out, ref), float(jnp.max(jnp.abs(out - ref)))

    # Case 2: exercise the tiled (multi-grid-step) path by forcing a tiny block budget.
    key2 = jax.random.PRNGKey(1)
    expand2 = [2, 3, 1, 2]                    # 5 input joints -> 9 output joints
    N2, C2, T2 = 2, 16, 256
    J2 = 1 + len(expand2)
    x2 = jax.random.normal(key2, (N2, C2, J2, T2), dtype=jnp.float32)

    module2 = SkeletonUnPoolPallas(expand2)
    out2 = jax.block_until_ready(module2(x2, target_pair_bytes=64 << 10))
    ref2 = jax.block_until_ready(module2.reference(x2))
    assert out2.shape == ref2.shape == (N2, C2, 1 + sum(expand2), T2)
    assert jnp.array_equal(out2, ref2), float(jnp.max(jnp.abs(out2 - ref2)))

    print("KERNEL_OK")
</pallas_src>

<mosaic_0001>
module attributes {stable_mosaic.version = 11 : i64} {
  func.func @kernel(%arg0: i32, %arg1: i32, %arg2: memref<8x4x16xf32, #tpu.memory_space<vmem>>, %arg3: memref<8x7x16xf32, #tpu.memory_space<vmem>>) attributes {dimension_semantics = [#tpu.dimension_semantics<parallel>, #tpu.dimension_semantics<parallel>], iteration_bounds = array<i64: 1, 1>, scalar_prefetch = 0 : i64, scratch_operands = 0 : i64, tpu.core_type = #tpu.core_type<tc>, window_params = [{transform_indices = @transform_0, window_bounds = array<i64: 8, 4, 16>}, {transform_indices = @transform_1, window_bounds = array<i64: 8, 7, 16>}]} {
    %c0 = arith.constant 0 : index
    %c0_0 = arith.constant 0 : index
    %c0_1 = arith.constant 0 : index
    %0 = vector.load %arg2[%c0, %c0_0, %c0_1] : memref<8x4x16xf32, #tpu.memory_space<vmem>>, vector<8x1x16xf32>
    %c0_2 = arith.constant 0 : index
    %c0_3 = arith.constant 0 : index
    %c0_4 = arith.constant 0 : index
    %1 = vector.load %arg3[%c0_2, %c0_3, %c0_4] : memref<8x7x16xf32, #tpu.memory_space<vmem>>, vector<8x1x16xf32>
    tpu.vector_store %arg3[%c0_2, %c0_3, %c0_4], %0 {strides = array<i32>} : memref<8x7x16xf32, #tpu.memory_space<vmem>>, vector<8x1x16xf32>,
    %c0_5 = arith.constant 0 : index
    %c1 = arith.constant 1 : index
    %c0_6 = arith.constant 0 : index
    %2 = vector.load %arg2[%c0_5, %c1, %c0_6] : memref<8x4x16xf32, #tpu.memory_space<vmem>>, vector<8x1x16xf32>
    %c0_7 = arith.constant 0 : index
    %c1_8 = arith.constant 1 : index
    %c0_9 = arith.constant 0 : index
    %3 = vector.load %arg3[%c0_7, %c1_8, %c0_9] : memref<8x7x16xf32, #tpu.memory_space<vmem>>, vector<8x1x16xf32>
    tpu.vector_store %arg3[%c0_7, %c1_8, %c0_9], %2 {strides = array<i32>} : memref<8x7x16xf32, #tpu.memory_space<vmem>>, vector<8x1x16xf32>,
    %c0_10 = arith.constant 0 : index
    %c2 = arith.constant 2 : index
    %c0_11 = arith.constant 0 : index
    %4 = vector.load %arg3[%c0_10, %c2, %c0_11] : memref<8x7x16xf32, #tpu.memory_space<vmem>>, vector<8x1x16xf32>
    tpu.vector_store %arg3[%c0_10, %c2, %c0_11], %2 {strides = array<i32>} : memref<8x7x16xf32, #tpu.memory_space<vmem>>, vector<8x1x16xf32>,
    %c0_12 = arith.constant 0 : index
    %c2_13 = arith.constant 2 : index
    %c0_14 = arith.constant 0 : index
    %5 = vector.load %arg2[%c0_12, %c2_13, %c0_14] : memref<8x4x16xf32, #tpu.memory_space<vmem>>, vector<8x1x16xf32>
    %c0_15 = arith.constant 0 : index
    %c3 = arith.constant 3 : index
    %c0_16 = arith.constant 0 : index
    %6 = vector.load %arg3[%c0_15, %c3, %c0_16] : memref<8x7x16xf32, #tpu.memory_space<vmem>>, vector<8x1x16xf32>
    tpu.vector_store %arg3[%c0_15, %c3, %c0_16], %5 {strides = array<i32>} : memref<8x7x16xf32, #tpu.memory_space<vmem>>, vector<8x1x16xf32>,
    %c0_17 = arith.constant 0 : index
    %c3_18 = arith.constant 3 : index
    %c0_19 = arith.constant 0 : index
    %7 = vector.load %arg2[%c0_17, %c3_18, %c0_19] : memref<8x4x16xf32, #tpu.memory_space<vmem>>, vector<8x1x16xf32>
    %c0_20 = arith.constant 0 : index
    %c4 = arith.constant 4 : index
    %c0_21 = arith.constant 0 : index
    %8 = vector.load %arg3[%c0_20, %c4, %c0_21] : memref<8x7x16xf32, #tpu.memory_space<vmem>>, vector<8x1x16xf32>
    tpu.vector_store %arg3[%c0_20, %c4, %c0_21], %7 {strides = array<i32>} : memref<8x7x16xf32, #tpu.memory_space<vmem>>, vector<8x1x16xf32>,
    %c0_22 = arith.constant 0 : index
    %c5 = arith.constant 5 : index
    %c0_23 = arith.constant 0 : index
    %9 = vector.load %arg3[%c0_22, %c5, %c0_23] : memref<8x7x16xf32, #tpu.memory_space<vmem>>, vector<8x1x16xf32>
    tpu.vector_store %arg3[%c0_22, %c5, %c0_23], %7 {strides = array<i32>} : memref<8x7x16xf32, #tpu.memory_space<vmem>>, vector<8x1x16xf32>,
    %c0_24 = arith.constant 0 : index
    %c6 = arith.constant 6 : index
    %c0_25 = arith.constant 0 : index
    %10 = vector.load %arg3[%c0_24, %c6, %c0_25] : memref<8x7x16xf32, #tpu.memory_space<vmem>>, vector<8x1x16xf32>
    tpu.vector_store %arg3[%c0_24, %c6, %c0_25], %7 {strides = array<i32>} : memref<8x7x16xf32, #tpu.memory_space<vmem>>, vector<8x1x16xf32>,
    return
  }
  func.func @transform_0(%arg0: i32, %arg1: i32) -> (i32, i32, i32) {
    %c0_i32 = arith.constant 0 : i32
    %c0_i32_0 = arith.constant 0 : i32
    return %arg0, %c0_i32, %arg1 : i32, i32, i32
  }
  func.func @transform_1(%arg0: i32, %arg1: i32) -> (i32, i32, i32) {
    %c0_i32 = arith.constant 0 : i32
    %c0_i32_0 = arith.constant 0 : i32
    return %arg0, %c0_i32, %arg1 : i32, i32, i32
  }
}

</mosaic_0001>

<bundles_post_ra>
// kernel: tpu_custom_call.1
= control target key start
LH: loop header
LB: loop body
LE: loop exit
PB: predicated region body
PF: predicated region fallthrough
CT: control target
= control target key end

     0   :  { %6 = vsyncpa [#allocation3], 0  ;;  %s143_s6 = smov [#allocation2]   ;;  %s392_s0 = inlined_call_operand.hbm [shape: f32[8,4,16], index: 0, kind: input, shape index: {}]   ;;  %s393_s1 = inlined_call_operand.vmem [shape: f32[8,7,16], index: 1, kind: output, shape index: {}]  }
   0x1   :  { %s12_s7 = sshll.u32 %s143_s6, 4  ;;  %s119_s10 = scalar_lea.hbm %s392_s0, 512  ;;  %s13_s7 = int_to_ptr.vmem [resolvable:$true] %s12_s7 }
   0x2   :  { %p120_p0 = scmp.ne.s32.totalorder %s392_s0, %s119_s10  ;;  %p123_p1 = scmp.lt.u32.totalorder %s119_s10, %s392_s0 }
   0x4   :  { %p125_p2 = pnand %p123_p1, %p120_p0 }
   0x6   :  { %128 = shalt.err (!%p125_p2)
}
   0x7   :  { %s129_s15 = scalar_lea.vmem %s13_s7, 512  ;;  %p134_p4 = scmp.lt.s32.totalorder %s13_s7, %s13_s7 }
   0x8   :  { %p130_p3 = scmp.ne.s32.totalorder %s13_s7, %s129_s15  ;;  %p135_p5 = scmp.lt.s32.totalorder %s129_s15, %s129_s15 }
   0xa   :  { %p136_p6 = por %p135_p5, %p134_p4 }
   0xc   :  { %p137_p7 = pnand %p136_p6, %p130_p3 }
   0xe   :  { %140 = shalt.err (!%p137_p7)
}
   0xf   :  { %s144_s16 = smov 64   ;;  %s145_s17 = smov 4  }
  0x10   :  { %18 = dma.hbm_to_vmem [thread:$0]  %s392_s0, 512, %s13_s7, [#allocation3], %s144_s16, %s144_s16, %s145_s17  }
  0x11   :  { %141 = dma.done.wait [#allocation3], 512  }
  0x12   :  { %142 = vsyncadd [#allocation3], 4294966784  ;;  %vm30_vm0 = vcmask 122880   ;;  %v22_v0 = vld [vmem:[#allocation2] sm:$0x1] }
  0x13   :  { %v23_v1 = vld [vmem:[#allocation2 + $0x4] sm:$0x1]  ;;  %v24_v2 = vld [vmem:[#allocation2 + $0x8] sm:$0x1]  ;;  %31 = vst.msk [vmem:[%s393_s1] sm:$0x1] %vm30_vm0, %v22_v0 }
  0x14   :  { %32 = vst.msk [vmem:[%s393_s1 + $0x8] sm:$0x1] %vm30_vm0, %v23_v1  ;;  %33 = vst.msk [vmem:[%s393_s1 + $0x10] sm:$0x1] %vm30_vm0, %v24_v2  ;;  %v25_v3 = vld [vmem:[#allocation2 + $0xc] sm:$0x1] }
  0x15   :  { %v26_v4 = vld [vmem:[#allocation2 + $0x10] sm:$0x1]  ;;  %v27_v5 = vld [vmem:[#allocation2 + $0x14] sm:$0x1]  ;;  %34 = vst.msk [vmem:[%s393_s1 + $0x18] sm:$0x1] %vm30_vm0, %v25_v3 }
  0x16   :  { %35 = vst.msk [vmem:[%s393_s1 + $0x20] sm:$0x1] %vm30_vm0, %v26_v4  ;;  %36 = vst.msk [vmem:[%s393_s1 + $0x28] sm:$0x1] %vm30_vm0, %v27_v5  ;;  %v28_v6 = vld [vmem:[#allocation2 + $0x18] sm:$0x1] }
  0x17   :  { %v29_v7 = vld [vmem:[#allocation2 + $0x1c] sm:$0x1]  ;;  %v39_v8 = vld [vmem:[#allocation2 + $0x1] sm:$0x1]  ;;  %37 = vst.msk [vmem:[%s393_s1 + $0x30] sm:$0x1] %vm30_vm0, %v28_v6 }
  0x18   :  { %38 = vst.msk [vmem:[%s393_s1 + $0x38] sm:$0x1] %vm30_vm0, %v29_v7  ;;  %47 = vst.msk [vmem:[%s393_s1 + $0x1] sm:$0x1] %vm30_vm0, %v39_v8  ;;  %v40_v9 = vld [vmem:[#allocation2 + $0x5] sm:$0x1] }
  0x19   :  { %55 = vst.msk [vmem:[%s393_s1 + $0x2] sm:$0x1] %vm30_vm0, %v39_v8  ;;  %v41_v10 = vld [vmem:[#allocation2 + $0x9] sm:$0x1]  ;;  %v42_v11 = vld [vmem:[#allocation2 + $0xd] sm:$0x1] }
  0x1a   :  { %48 = vst.msk [vmem:[%s393_s1 + $0x9] sm:$0x1] %vm30_vm0, %v40_v9  ;;  %56 = vst.msk [vmem:[%s393_s1 + $0xa] sm:$0x1] %vm30_vm0, %v40_v9  ;;  %v43_v12 = vld [vmem:[#allocation2 + $0x11] sm:$0x1] }
  0x1b   :  { %49 = vst.msk [vmem:[%s393_s1 + $0x11] sm:$0x1] %vm30_vm0, %v41_v10  ;;  %57 = vst.msk [vmem:[%s393_s1 + $0x12] sm:$0x1] %vm30_vm0, %v41_v10  ;;  %v44_v13 = vld [vmem:[#allocation2 + $0x15] sm:$0x1] }
  0x1c   :  { %50 = vst.msk [vmem:[%s393_s1 + $0x19] sm:$0x1] %vm30_vm0, %v42_v11  ;;  %58 = vst.msk [vmem:[%s393_s1 + $0x1a] sm:$0x1] %vm30_vm0, %v42_v11  ;;  %v45_v14 = vld [vmem:[#allocation2 + $0x19] sm:$0x1] }
  0x1d   :  { %51 = vst.msk [vmem:[%s393_s1 + $0x21] sm:$0x1] %vm30_vm0, %v43_v12  ;;  %59 = vst.msk [vmem:[%s393_s1 + $0x22] sm:$0x1] %vm30_vm0, %v43_v12  ;;  %v46_v15 = vld [vmem:[#allocation2 + $0x1d] sm:$0x1] }
  0x1e   :  { %52 = vst.msk [vmem:[%s393_s1 + $0x29] sm:$0x1] %vm30_vm0, %v44_v13  ;;  %60 = vst.msk [vmem:[%s393_s1 + $0x2a] sm:$0x1] %vm30_vm0, %v44_v13  ;;  %v63_v16 = vld [vmem:[#allocation2 + $0x2] sm:$0x1] }
  0x1f   :  { %53 = vst.msk [vmem:[%s393_s1 + $0x31] sm:$0x1] %vm30_vm0, %v45_v14  ;;  %61 = vst.msk [vmem:[%s393_s1 + $0x32] sm:$0x1] %vm30_vm0, %v45_v14  ;;  %v64_v17 = vld [vmem:[#allocation2 + $0x6] sm:$0x1] }
  0x20   :  { %54 = vst.msk [vmem:[%s393_s1 + $0x39] sm:$0x1] %vm30_vm0, %v46_v15  ;;  %62 = vst.msk [vmem:[%s393_s1 + $0x3a] sm:$0x1] %vm30_vm0, %v46_v15  ;;  %v65_v18 = vld [vmem:[#allocation2 + $0xa] sm:$0x1] }
  0x21   :  { %71 = vst.msk [vmem:[%s393_s1 + $0x3] sm:$0x1] %vm30_vm0, %v63_v16  ;;  %72 = vst.msk [vmem:[%s393_s1 + $0xb] sm:$0x1] %vm30_vm0, %v64_v17  ;;  %v66_v19 = vld [vmem:[#allocation2 + $0xe] sm:$0x1] }
  0x22   :  { %v67_v20 = vld [vmem:[#allocation2 + $0x12] sm:$0x1]  ;;  %73 = vst.msk [vmem:[%s393_s1 + $0x13] sm:$0x1] %vm30_vm0, %v65_v18  ;;  %74 = vst.msk [vmem:[%s393_s1 + $0x1b] sm:$0x1] %vm30_vm0, %v66_v19 }
  0x23   :  { %75 = vst.msk [vmem:[%s393_s1 + $0x23] sm:$0x1] %vm30_vm0, %v67_v20  ;;  %v68_v21 = vld [vmem:[#allocation2 + $0x16] sm:$0x1]  ;;  %v69_v22 = vld [vmem:[#allocation2 + $0x1a] sm:$0x1] }
  0x24   :  { %v70_v23 = vld [vmem:[#allocation2 + $0x1e] sm:$0x1]  ;;  %76 = vst.msk [vmem:[%s393_s1 + $0x2b] sm:$0x1] %vm30_vm0, %v68_v21  ;;  %77 = vst.msk [vmem:[%s393_s1 + $0x33] sm:$0x1] %vm30_vm0, %v69_v22 }
  0x25   :  { %78 = vst.msk [vmem:[%s393_s1 + $0x3b] sm:$0x1] %vm30_vm0, %v70_v23  ;;  %v79_v24 = vld [vmem:[#allocation2 + $0x3] sm:$0x1]  ;;  %v80_v25 = vld [vmem:[#allocation2 + $0x7] sm:$0x1] }
  0x26   :  { %v81_v26 = vld [vmem:[#allocation2 + $0xb] sm:$0x1]  ;;  %87 = vst.msk [vmem:[%s393_s1 + $0x4] sm:$0x1] %vm30_vm0, %v79_v24  ;;  %95 = vst.msk [vmem:[%s393_s1 + $0x5] sm:$0x1] %vm30_vm0, %v79_v24 }
  0x27   :  { %103 = vst.msk [vmem:[%s393_s1 + $0x6] sm:$0x1] %vm30_vm0, %v79_v24  ;;  %88 = vst.msk [vmem:[%s393_s1 + $0xc] sm:$0x1] %vm30_vm0, %v80_v25  ;;  %v82_v27 = vld [vmem:[#allocation2 + $0xf] sm:$0x1] }
  0x28   :  { %96 = vst.msk [vmem:[%s393_s1 + $0xd] sm:$0x1] %vm30_vm0, %v80_v25  ;;  %104 = vst.msk [vmem:[%s393_s1 + $0xe] sm:$0x1] %vm30_vm0, %v80_v25  ;;  %v83_v28 = vld [vmem:[#allocation2 + $0x13] sm:$0x1] }
  0x29   :  { %89 = vst.msk [vmem:[%s393_s1 + $0x14] sm:$0x1] %vm30_vm0, %v81_v26  ;;  %97 = vst.msk [vmem:[%s393_s1 + $0x15] sm:$0x1] %vm30_vm0, %v81_v26  ;;  %v84_v29 = vld [vmem:[#allocation2 + $0x17] sm:$0x1] }
  0x2a   :  { %105 = vst.msk [vmem:[%s393_s1 + $0x16] sm:$0x1] %vm30_vm0, %v81_v26  ;;  %90 = vst.msk [vmem:[%s393_s1 + $0x1c] sm:$0x1] %vm30_vm0, %v82_v27  ;;  %v85_v30 = vld [vmem:[#allocation2 + $0x1b] sm:$0x1] }
  0x2b   :  { %98 = vst.msk [vmem:[%s393_s1 + $0x1d] sm:$0x1] %vm30_vm0, %v82_v27  ;;  %106 = vst.msk [vmem:[%s393_s1 + $0x1e] sm:$0x1] %vm30_vm0, %v82_v27  ;;  %v86_v31 = vld [vmem:[#allocation2 + $0x1f] sm:$0x1] }
  0x2c   :  { %91 = vst.msk [vmem:[%s393_s1 + $0x24] sm:$0x1] %vm30_vm0, %v83_v28  ;;  %99 = vst.msk [vmem:[%s393_s1 + $0x25] sm:$0x1] %vm30_vm0, %v83_v28 }
  0x2d   :  { %107 = vst.msk [vmem:[%s393_s1 + $0x26] sm:$0x1] %vm30_vm0, %v83_v28  ;;  %92 = vst.msk [vmem:[%s393_s1 + $0x2c] sm:$0x1] %vm30_vm0, %v84_v29 }
  0x2e   :  { %100 = vst.msk [vmem:[%s393_s1 + $0x2d] sm:$0x1] %vm30_vm0, %v84_v29  ;;  %108 = vst.msk [vmem:[%s393_s1 + $0x2e] sm:$0x1] %vm30_vm0, %v84_v29 }
  0x2f   :  { %93 = vst.msk [vmem:[%s393_s1 + $0x34] sm:$0x1] %vm30_vm0, %v85_v30  ;;  %101 = vst.msk [vmem:[%s393_s1 + $0x35] sm:$0x1] %vm30_vm0, %v85_v30 }
  0x30   :  { %109 = vst.msk [vmem:[%s393_s1 + $0x36] sm:$0x1] %vm30_vm0, %v85_v30  ;;  %94 = vst.msk [vmem:[%s393_s1 + $0x3c] sm:$0x1] %vm30_vm0, %v86_v31 }
  0x31   :  { %102 = vst.msk [vmem:[%s393_s1 + $0x3d] sm:$0x1] %vm30_vm0, %v86_v31  ;;  %110 = vst.msk [vmem:[%s393_s1 + $0x3e] sm:$0x1] %vm30_vm0, %v86_v31 }
  0x32   :  { %115 = vsyncpa [#allocation3], 1 }

</bundles_post_ra>
